<compile_context>
chip_gen: v6e
topology: v6e:2x2x1
jax: 0.10.0
libtpu: 0.0.40
codegen_flags: <defaults>
</compile_context>

<pallas_src>
import jax
import jax.numpy as jnp
from jax import lax
from jax.experimental import pallas as pl
from jax.experimental.pallas import tpu as pltpu

BLOCK_SIZE = 8     # max sequence length (tril buffer size in the module)
N_EMBED = 32       # n_embed in the module
HEAD_SIZE = 16     # head_size chosen for this synthetic instantiation


def head_kernel(x_ref, wqkv_ref, o_ref):
    # x_ref block: (Bb, T, C); wqkv: (C, 3H); o_ref block: (Bb, T, H)
    Bb, T, C = x_ref.shape
    H = o_ref.shape[-1]

    # --- Fused QKV projection: one MXU matmul on a (Bb*T, C) x (C, 3H) pair.
    x2d = x_ref[...].reshape(Bb * T, C)
    qkv = jnp.dot(x2d, wqkv_ref[...], preferred_element_type=jnp.float32)  # (Bb*T, 3H)
    qkv = qkv.reshape(Bb, T, 3 * H)
    q = qkv[:, :, 0 * H:1 * H]     # (Bb, T, H)
    k = qkv[:, :, 1 * H:2 * H]     # (Bb, T, H)
    v = qkv[:, :, 2 * H:3 * H]     # (Bb, T, H)

    # --- Attention scores scaled by C**-0.5 (PyTorch uses C = n_embed, NOT head_size).
    scale = jnp.float32(C) ** jnp.float32(-0.5)
    # Contract last dim of q with last dim of k, batched over dim 0 -> (Bb, T, T).
    # (No explicit transpose of k, so no XLU relayout before the MXU push.)
    wei = lax.dot_general(
        q, k,
        dimension_numbers=(((2,), (2,)), ((0,), (0,))),
        preferred_element_type=jnp.float32,
    ) * scale

    # --- Causal mask (tril): positions with col > row -> -inf.
    row = lax.broadcasted_iota(jnp.int32, (T, T), 0)
    col = lax.broadcasted_iota(jnp.int32, (T, T), 1)
    causal = (col <= row)[None, :, :]                      # (1, T, T), broadcast over Bb
    wei = jnp.where(causal, wei, -jnp.inf)

    # --- Softmax over last axis (numerically stable; diagonal always unmasked
    #     so the row max is finite).
    m = jnp.max(wei, axis=-1, keepdims=True)
    e = jnp.exp(wei - m)
    denom = jnp.sum(e, axis=-1, keepdims=True)
    p = e * pl.reciprocal(denom, approx=False)

    # --- Weighted sum of values: (Bb, T, T) x (Bb, T, H) -> (Bb, T, H).
    out = lax.dot_general(
        p, v,
        dimension_numbers=(((2,), (1,)), ((0,), (0,))),
        preferred_element_type=jnp.float32,
    )
    o_ref[...] = out.astype(o_ref.dtype)


def _num_tensorcores_per_chip():
    """2 on v7x (dual-TC), 1 on v5e/v6e. Safe fallback to 1."""
    try:
        kind = jax.devices()[0].device_kind.lower()
    except Exception:
        return 1
    return 2 if "v7" in kind else 1


def head_forward(x, wq_t, wk_t, wv_t):
    """x: (B, T, C) f32; w*_t: (C, H) f32 (already transposed from nn.Linear layout)."""
    B, T, C = x.shape
    H = wq_t.shape[1]

    # Fuse the three projection weights into one (C, 3H) operand.
    wqkv = jnp.concatenate([wq_t, wk_t, wv_t], axis=1)

    # Single grid step on single-TC chips (v5e/v6e); two parallel steps on v7x
    # so the batch axis shards across both TensorCores.
    n_tc = _num_tensorcores_per_chip()
    grid_b = n_tc if (B >= n_tc and B % n_tc == 0) else 1
    bb = B // grid_b

    return pl.pallas_call(
        head_kernel,
        out_shape=jax.ShapeDtypeStruct((B, T, H), x.dtype),
        grid_spec=pltpu.PrefetchScalarGridSpec(
            num_scalar_prefetch=0,
            grid=(grid_b,),
            in_specs=[
                pl.BlockSpec((bb, T, C), lambda i: (i, 0, 0)),
                pl.BlockSpec((C, 3 * H), lambda i: (0, 0)),
            ],
            out_specs=pl.BlockSpec((bb, T, H), lambda i: (i, 0, 0)),
        ),
        compiler_params=pltpu.CompilerParams(
            dimension_semantics=("parallel",)
        ),
    )(x, wqkv)


def head_reference(x, wq_t, wk_t, wv_t):
    """Pure-JAX reference mirroring the PyTorch forward."""
    B, T, C = x.shape
    k = x @ wk_t
    q = x @ wq_t
    v = x @ wv_t
    wei = (q @ jnp.swapaxes(k, -2, -1)) * (C ** -0.5)
    tril = jnp.tril(jnp.ones((T, T), dtype=bool))
    wei = jnp.where(tril, wei, -jnp.inf)
    wei = jax.nn.softmax(wei, axis=-1)
    return wei @ v


if __name__ == "__main__":
    key = jax.random.PRNGKey(0)
    kx, kk, kq, kv = jax.random.split(key, 4)

    B, T, C, H = 2, BLOCK_SIZE, N_EMBED, HEAD_SIZE

    # Deterministic parameter init (nn.Linear weight shape is (H, C); we store W.T = (C, H)).
    x = jax.random.normal(kx, (B, T, C), dtype=jnp.float32)
    wk_t = (jax.random.uniform(kk, (H, C), dtype=jnp.float32, minval=-1.0, maxval=1.0)
            * (C ** -0.5)).T
    wq_t = (jax.random.uniform(kq, (H, C), dtype=jnp.float32, minval=-1.0, maxval=1.0)
            * (C ** -0.5)).T
    wv_t = (jax.random.uniform(kv, (H, C), dtype=jnp.float32, minval=-1.0, maxval=1.0)
            * (C ** -0.5)).T

    out = head_forward(x, wq_t, wk_t, wv_t)
    out = jax.block_until_ready(out)

    ref = head_reference(x, wq_t, wk_t, wv_t)
    assert out.shape == (B, T, H), out.shape
    assert jnp.allclose(out, ref, atol=1e-5, rtol=1e-5), "mismatch vs reference"

    print("KERNEL_OK")
</pallas_src>

<mosaic_0001>
module attributes {stable_mosaic.version = 11 : i64} {
  func.func @head_kernel(%arg0: i32, %arg1: memref<2x8x32xf32, #tpu.memory_space<vmem>>, %arg2: memref<32x48xf32, #tpu.memory_space<vmem>>, %arg3: memref<2x8x16xf32, #tpu.memory_space<vmem>>) attributes {dimension_semantics = [#tpu.dimension_semantics<parallel>], iteration_bounds = array<i64: 1>, scalar_prefetch = 0 : i64, scratch_operands = 0 : i64, tpu.core_type = #tpu.core_type<tc>, window_params = [{transform_indices = @transform_0, window_bounds = array<i64: 2, 8, 32>}, {pipeline_mode = #tpu.pipeline_mode<synchronous>, transform_indices = @transform_1, window_bounds = array<i64: 32, 48>}, {transform_indices = @transform_2, window_bounds = array<i64: 2, 8, 16>}]} {
    %c0 = arith.constant 0 : index
    %c0_0 = arith.constant 0 : index
    %c0_1 = arith.constant 0 : index
    %0 = vector.load %arg1[%c0, %c0_0, %c0_1] : memref<2x8x32xf32, #tpu.memory_space<vmem>>, vector<2x8x32xf32>
    %1 = vector.shape_cast %0 : vector<2x8x32xf32> to vector<16x32xf32>
    %c0_2 = arith.constant 0 : index
    %c0_3 = arith.constant 0 : index
    %2 = vector.load %arg2[%c0_2, %c0_3] : memref<32x48xf32, #tpu.memory_space<vmem>>, vector<32x48xf32>
    %cst = arith.constant dense<0.000000e+00> : vector<16x48xf32>
    %3 = tpu.matmul %1, %2, %cst {dimension_numbers = #tpu.dot_dimension_numbers<[1], [0], [0], [1], [0, 0, 1, 1], [], []>} : vector<16x32xf32>, vector<32x48xf32>, vector<16x48xf32> -> vector<16x48xf32>
    %4 = vector.shape_cast %3 : vector<16x48xf32> to vector<2x8x48xf32>
    %5 = vector.extract_strided_slice %4 {offsets = [0, 0, 0], sizes = [2, 8, 16], strides = [1, 1, 1]} : vector<2x8x48xf32> to vector<2x8x16xf32>
    %6 = vector.extract_strided_slice %4 {offsets = [0, 0, 16], sizes = [2, 8, 16], strides = [1, 1, 1]} : vector<2x8x48xf32> to vector<2x8x16xf32>
    %7 = vector.extract_strided_slice %4 {offsets = [0, 0, 32], sizes = [2, 8, 16], strides = [1, 1, 1]} : vector<2x8x48xf32> to vector<2x8x16xf32>
    %cst_4 = arith.constant 3.200000e+01 : f32
    %cst_5 = arith.constant -5.000000e-01 : f32
    %8 = math.powf %cst_4, %cst_5 : f32
    %cst_6 = arith.constant dense<0.000000e+00> : vector<2x8x8xf32>
    %9 = tpu.matmul %5, %6, %cst_6 {dimension_numbers = #tpu.dot_dimension_numbers<[2], [2], [1], [1], [0, 0, 0, 1, 1, 1], [0], [0]>} : vector<2x8x16xf32>, vector<2x8x16xf32>, vector<2x8x8xf32> -> vector<2x8x8xf32>
    %10 = vector.broadcast %8 : f32 to vector<2x8x8xf32>
    %11 = arith.mulf %9, %10 : vector<2x8x8xf32>
    %12 = tpu.iota {dimensions = array<i32: 0>} : vector<8x8xi32>
    %13 = tpu.iota {dimensions = array<i32: 1>} : vector<8x8xi32>
    %14 = arith.cmpi sle, %13, %12 : vector<8x8xi32>
    %15 = vector.shape_cast %14 : vector<8x8xi1> to vector<1x8x8xi1>
    %cst_7 = arith.constant 0xFF800000 : f32
    %16 = vector.shape_cast %15 : vector<1x8x8xi1> to vector<1x8x8xi1>
    %17 = vector.broadcast %16 : vector<1x8x8xi1> to vector<2x8x8xi1>
    %18 = vector.broadcast %cst_7 : f32 to vector<2x8x8xf32>
    %19 = arith.select %17, %11, %18 : vector<2x8x8xi1>, vector<2x8x8xf32>
    %cst_8 = arith.constant dense<0xFF800000> : vector<2x8xf32>
    %20 = vector.multi_reduction <maximumf>, %19, %cst_8 [2] : vector<2x8x8xf32> to vector<2x8xf32>
    %21 = vector.shape_cast %20 : vector<2x8xf32> to vector<2x8x1xf32>
    %22 = vector.broadcast %21 : vector<2x8x1xf32> to vector<2x8x8xf32>
    %23 = arith.subf %19, %22 : vector<2x8x8xf32>
    %24 = math.exp %23 : vector<2x8x8xf32>
    %cst_9 = arith.constant dense<0.000000e+00> : vector<2x8xf32>
    %25 = vector.multi_reduction <add>, %24, %cst_9 [2] : vector<2x8x8xf32> to vector<2x8xf32>
    %26 = vector.shape_cast %25 : vector<2x8xf32> to vector<2x8x1xf32>
    %27 = tpu.reciprocal %26 : vector<2x8x1xf32> -> vector<2x8x1xf32>
    %28 = vector.broadcast %27 : vector<2x8x1xf32> to vector<2x8x8xf32>
    %29 = arith.mulf %24, %28 : vector<2x8x8xf32>
    %cst_10 = arith.constant dense<0.000000e+00> : vector<2x8x16xf32>
    %30 = tpu.matmul %29, %7, %cst_10 {dimension_numbers = #tpu.dot_dimension_numbers<[2], [1], [1], [2], [0, 0, 0, 1, 1, 2], [0], [0]>} : vector<2x8x8xf32>, vector<2x8x16xf32>, vector<2x8x16xf32> -> vector<2x8x16xf32>
    %c0_11 = arith.constant 0 : index
    %c0_12 = arith.constant 0 : index
    %c0_13 = arith.constant 0 : index
    %31 = vector.load %arg3[%c0_11, %c0_12, %c0_13] : memref<2x8x16xf32, #tpu.memory_space<vmem>>, vector<2x8x16xf32>
    tpu.vector_store %arg3[%c0_11, %c0_12, %c0_13], %30 {strides = array<i32>} : memref<2x8x16xf32, #tpu.memory_space<vmem>>, vector<2x8x16xf32>,
    return
  }
  func.func @transform_0(%arg0: i32) -> (i32, i32, i32) {
    %c0_i32 = arith.constant 0 : i32
    %c0_i32_0 = arith.constant 0 : i32
    %c0_i32_1 = arith.constant 0 : i32
    return %arg0, %c0_i32, %c0_i32_0 : i32, i32, i32
  }
  func.func @transform_1(%arg0: i32) -> (i32, i32) {
    %c0_i32 = arith.constant 0 : i32
    %c0_i32_0 = arith.constant 0 : i32
    %c0_i32_1 = arith.constant 0 : i32
    return %c0_i32, %c0_i32_0 : i32, i32
  }
  func.func @transform_2(%arg0: i32) -> (i32, i32, i32) {
    %c0_i32 = arith.constant 0 : i32
    %c0_i32_0 = arith.constant 0 : i32
    %c0_i32_1 = arith.constant 0 : i32
    return %arg0, %c0_i32, %c0_i32_0 : i32, i32, i32
  }
}

</mosaic_0001>

<bundles_post_ra>
// kernel: tpu_custom_call.1
= control target key start
LH: loop header
LB: loop body
LE: loop exit
PB: predicated region body
PF: predicated region fallthrough
CT: control target
= control target key end

     0   :  { %7 = vsyncpa [#allocation3], 0  ;;  %s685_s0 = inlined_call_operand.hbm [shape: f32[2,8,32], index: 0, kind: input, shape index: {}]   ;;  %s686_s1 = inlined_call_operand.hbm [shape: f32[32,48], index: 1, kind: input, shape index: {}]   ;;  %s687_s2 = inlined_call_operand.hbm [shape: f32[2,8,16], index: 2, kind: output, shape index: {}]  }
   0x1   :  { %8 = vsyncpa [#allocation6], 0 }
   0x2   :  { %9 = vsyncpa [#allocation4], 0  ;;  %s625_s9 = smov [#allocation2]  }
   0x3   :  { %s15_s10 = sshll.u32 %s625_s9, 4  ;;  %s16_s10 = int_to_ptr.vmem [resolvable:$true] %s15_s10 }
   0x4   :  { %s567_s11 = scalar_lea.vmem %s16_s10, 256  ;;  %p572_p1 = scmp.lt.s32.totalorder %s16_s10, %s16_s10 }
   0x5   :  { %p568_p0 = scmp.ne.s32.totalorder %s16_s10, %s567_s11  ;;  %p573_p2 = scmp.lt.s32.totalorder %s567_s11, %s567_s11 }
   0x7   :  { %p574_p3 = por %p573_p2, %p572_p1 }
   0x9   :  { %p575_p4 = pnand %p574_p3, %p568_p0 }
   0xb   :  { %578 = shalt.err (!%p575_p4)
}
   0xc   :  { %s626_s12 = smov 128   ;;  %s627_s13 = smov 8  }
   0xd   :  { %21 = dma.hbm_to_vmem [thread:$0]  %s685_s0, 256, %s16_s10, [#allocation3], %s626_s12, %s626_s12, %s627_s13  }
   0xe   :  { %s628_s16 = smov [#allocation5]  }
   0xf   :  { %s27_s17 = sshll.u32 %s628_s16, 4  ;;  %s28_s17 = int_to_ptr.vmem [resolvable:$true] %s27_s17 }
  0x10   :  { %s587_s18 = scalar_lea.vmem %s28_s17, 512  ;;  %p592_p6 = scmp.lt.s32.totalorder %s28_s17, %s28_s17 }
  0x11   :  { %p588_p5 = scmp.ne.s32.totalorder %s28_s17, %s587_s18  ;;  %p593_p7 = scmp.lt.s32.totalorder %s587_s18, %s587_s18 }
  0x13   :  { %p594_p8 = por %p593_p7, %p592_p6 }
  0x15   :  { %p595_p9 = pnand %p594_p8, %p588_p5 }
  0x17   :  { %598 = shalt.err (!%p595_p9)
}
  0x18   :  { %33 = dma.hbm_to_vmem [thread:$0]  %s686_s1, 512, %s28_s17, [#allocation6], %s626_s12, %s626_s12, %s627_s13  }
  0x19   :  { %619 = dma.done.wait [#allocation3], 256  }
  0x1a   :  { %620 = vsyncadd [#allocation3], 4294967040 }
  0x1b   :  { %621 = dma.done.wait [#allocation6], 512  }
  0x1c   :  { %622 = vsyncadd [#allocation6], 4294966784  ;;  %vm46_vm0 = vcmask 261120   ;;  %v45_v0 = vld [vmem:[#allocation5 + $0x18] sm:$0xff]  ;;  %v44_v1 = vld [vmem:[#allocation5 + $0x10] sm:$0xff]  ;;  %v629_v6 = vmov 0.0   ;;  %v285_v11 = vlaneseq }
  0x1d   :  { %511 = vmatprep.subr.mxu0 %v45_v0  ;;  %v40_v2 = vld [vmem:[#allocation2] sm:$0xff]  ;;  %v43_v3 = vld [vmem:[#allocation5 + $0x8] sm:$0xff]  ;;  %v42_v4 = vld [vmem:[#allocation5] sm:$0xff]  ;;  %522 = vmatprep.subr.mxu1 %v629_v6  ;;  %vm630_vm1 = vmmov 0   ;;  %s631_s0 = smov 112   ;;  %vm131_vm2 = vcmask 130048  }
  0x1e   :  { %512 = vmatpush3.msra.mxu0 %v45_v0  ;;  %519 = vmatprep.mubr.msk.f32.mxu0 %vm46_vm0, %v40_v2  ;;  %v41_v5 = vld [vmem:[#allocation2 + $0x8] sm:$0xff]  ;;  %v286_v12 = vshrl.u32 %v285_v11, 7  ;;  %v288_v13 = vand.u32 127, %v285_v11  ;;  %vm294_vm4 = vcmask 64512   ;;  %s632_s1 = smov 96   ;;  %s633_s21 = smov [#allocation7]  }
  0x1f   :  { %513 = vmatprep.subr.mxu0 %v44_v1  ;;  %524 = vmatprep.mubr.msk.f32.mxu1 %vm630_vm1, %v629_v6  ;;  %s476_s22 = sshll.u32 %s633_s21, 4  ;;  %s477_s22 = int_to_ptr.vmem [resolvable:$true] %s476_s22 }
  0x20   :  { %514 = vmatpush3.msra.mxu0 %v44_v1  ;;  %vm289_vm3 = vcmp.le.s32.totalorder %v288_v13, %v286_v12  ;;  %s599_s23 = scalar_lea.vmem %s477_s22, 256  ;;  %p604_p11 = scmp.lt.s32.totalorder %s477_s22, %s477_s22 }
  0x21   :  { %515 = vmatprep.subr.mxu0 %v43_v3  ;;  %p600_p10 = scmp.ne.s32.totalorder %s477_s22, %s599_s23  ;;  %p605_p12 = scmp.lt.s32.totalorder %s599_s23, %s599_s23 }
  0x22   :  { %516 = vmatpush3.msra.mxu0 %v43_v3 }
  0x23   :  { %517 = vmatprep.subr.mxu0 %v42_v4  ;;  %p606_p13 = por %p605_p12, %p604_p11 }
  0x24   :  { %518 = vmatpush3.msra.mxu0 %v42_v4 }
  0x25   :  { %520 = vmatmul.mubr.msk.f32.vlgmr.msra.gmra.mxu0 %vm46_vm0, %v41_v5  ;;  %532 = vmatprep.subr.mxu0 %v629_v6  ;;  %p607_p0 = pnand %p606_p13, %p600_p10 }
  0x26   :  { %534 = vmatprep.mubr.msk.f32.mxu0 %vm630_vm1, %v629_v6 }
  0xe5   :  { %v521_v7 = vpop.f32.mrf.mxu0 }
  0xe7   :  { %v119_v8 = vpop.f32.mrf.mxu0 }
  0xe8   :  { %129 = vrot.lane.b32.xlu0 %v119_v8, %s631_s0 }
  0xec   :  { %207 = vrot.lane.b32.xlu0 %v521_v7, %s631_s0 }
 0x15a   :  { %v130_v9 = vpop.permute.xlu0 %129 }
 0x15b   :  { %523 = vmatpush3.xpose.msk.msra.mxu1 %vm131_vm2, %v130_v9 }
 0x15c   :  { %527 = vmatprep.subr.mxu1 %v629_v6 }
 0x15e   :  { %525 = vmatmul.mubr.msk.f32.vlgmr.msra.gmra.mxu1 %vm131_vm2, %v119_v8  ;;  %v208_v10 = vpop.permute.xlu0 %207 }
 0x15f   :  { %528 = vmatpush3.xpose.msk.msra.mxu1 %vm131_vm2, %v208_v10  ;;  %529 = vmatprep.mubr.msk.f32.mxu1 %vm630_vm1, %v629_v6 }
 0x160   :  { %537 = vmatprep.subr.mxu1 %v629_v6 }
 0x162   :  { %530 = vmatmul.mubr.msk.f32.vlgmr.msra.gmra.mxu1 %vm131_vm2, %v521_v7 }
 0x163   :  { %539 = vmatprep.mubr.msk.f32.mxu1 %vm630_vm1, %v629_v6 }
 0x21e   :  { %v202_v14 = vpop.f32.mrf.mxu1 }
 0x21f   :  { %v283_v15 = vmul.f32 0.17677669, %v202_v14 }
 0x220   :  { %v526_v16 = vpop.f32.mrf.mxu1 }
 0x221   :  { %v292_v17 = vsel %vm289_vm3, %v283_v15, -inf }
 0x222   :  { %v279_v18 = vpop.f32.mrf.mxu1  ;;  %v295_v19 = vsel %vm294_vm4, %v292_v17, -inf }
 0x223   :  { %v284_v20 = vmul.f32 0.17677669, %v279_v18  ;;  %296 = vmax.xlane.f32.xlu1 %v295_v19 }
 0x224   :  { %v531_v21 = vpop.f32.mrf.mxu1 }
 0x225   :  { %v293_v22 = vsel %vm289_vm3, %v284_v20, -inf }
 0x226   :  { %v298_v23 = vsel %vm294_vm4, %v293_v22, -inf }
 0x227   :  { %299 = vmax.xlane.f32.xlu1 %v298_v23 }
 0x238   :  { %317 = vrot.lane.b32.xlu1 %v119_v8, %s632_s1 }
 0x2ac   :  { %v297_v24 = vpop.xlane.xlu1 %296 }
 0x2ad   :  { %v301_v25 = vsub.f32 %v292_v17, %v297_v24 }
 0x2af   :  { %v303_v26 = vmul.f32 1.442695, %v301_v25 }
 0x2b0   :  { %v300_v27 = vpop.xlane.xlu1 %299 }
 0x2b1   :  { %551 = vpow2.f32 %v303_v26  ;;  %v302_v28 = vsub.f32 %v293_v22, %v300_v27 }
 0x2b3   :  { %v305_v29 = vmul.f32 1.442695, %v302_v28 }
 0x2b4   :  { %v318_v30 = vpop.permute.xlu1 %317 }
 0x2b5   :  { %553 = vpow2.f32 %v305_v29  ;;  %533 = vmatpush3.msra.mxu0 %v318_v30 }
 0x2be   :  { %v552_v31 = vpop.eup %551 }
 0x2bf   :  { %v307_v32 = vsel %vm294_vm4, %v552_v31, 0.0 }
 0x2c0   :  { %308 = vadd.xlane.f32.xlu0 %v307_v32 }
 0x2c2   :  { %v554_v33 = vpop.eup %553 }
 0x2c3   :  { %v310_v34 = vsel %vm294_vm4, %v554_v33, 0.0 }
 0x2c4   :  { %311 = vadd.xlane.f32.xlu1 %v310_v34 }
 0x2d5   :  { %393 = vrot.lane.b32.xlu1 %v521_v7, %s632_s1 }
 0x349   :  { %v309_v35 = vpop.xlane.xlu0 %308 }
 0x34a   :  { %555 = vrcp.f32 %v309_v35 }
 0x34d   :  { %v312_v36 = vpop.xlane.xlu1 %311 }
 0x34e   :  { %557 = vrcp.f32 %v312_v36 }
 0x351   :  { %v394_v37 = vpop.permute.xlu1 %393 }
 0x352   :  { %538 = vmatpush3.msra.mxu1 %v394_v37 }
 0x357   :  { %v556_v38 = vpop.eup %555 }
 0x358   :  { %v315_v39 = vmul.f32 %v556_v38, %v552_v31 }
 0x35a   :  { %535 = vmatmul.mubr.msk.f32.vlgmr.msra.gmra.mxu0 %vm294_vm4, %v315_v39 }
 0x35b   :  { %v558_v40 = vpop.eup %557 }
 0x35c   :  { %v316_v41 = vmul.f32 %v558_v40, %v554_v33 }
 0x35e   :  { %540 = vmatmul.mubr.msk.f32.vlgmr.msra.gmra.mxu1 %vm294_vm4, %v316_v41 }
 0x41a   :  { %v389_v42 = vpop.f32.mrf.mxu0 }
 0x41b   :  { %469 = vst.msk [vmem:[#allocation7] sm:$0xff] %vm131_vm2, %v389_v42 }
 0x41c   :  { %v536_v43 = vpop.f32.mrf.mxu0 }
 0x41e   :  { %v465_v44 = vpop.f32.mrf.mxu1 }
 0x41f   :  { %470 = vst.msk [vmem:[#allocation7 + $0x8] sm:$0xff] %vm131_vm2, %v465_v44 }
 0x420   :  { %v541_v45 = vpop.f32.mrf.mxu1 }
 0x421   :  { %610 = shalt.err (!%p607_p0)
}
 0x422   :  { %482 = dma.vmem_to_hbm [thread:$0]  %s477_s22, 256, %s687_s2, [#allocation4], %s626_s12, %s626_s12, %s627_s13  }
 0x423   :  { %623 = dma.done.wait [#allocation4], 256  }
 0x424   :  { %624 = vsyncadd [#allocation4], 4294967040 }
 0x425   :  { %486 = vsyncpa [#allocation3], 1 }
 0x426   :  { %487 = vsyncpa [#allocation6], 1 }
 0x427   :  { %488 = vsyncpa [#allocation4], 1 }

</bundles_post_ra>
